<compile_context>
chip_gen: v7x
topology: tpu7x:2x2x1
jax: 0.10.0
libtpu: 0.0.40
codegen_flags: <defaults>
</compile_context>

<pallas_src>
import functools

import numpy as np
import jax
import jax.numpy as jnp
from jax.experimental import pallas as pl
from jax.experimental.pallas import tpu as pltpu


OUT_PAD = 128      # lane-dense padded output width: route -> cols 0:2, speed -> cols 2:2+speed_dim
N_PAD = 32         # per-batch query count (20 route + 10 speed = 30) padded to a multiple of 8
MAX_BATCH_TILE = 8 # 8 * 32 = 256 rows/step -> fills the 256x256 MXU on v6e/v7x


# ---------------------------------------------------------------------------
# Fused heads kernel (one grid step = one tile of `bb` batches):
#   x   = feat tile                              (bb, N_PAD, H)   bf16
#   h   = SiLU(x @ W1_cat + b1_cat)              (bb*N_PAD, 2M)   f32
#   y   = h @ W2_blockdiag_padded                (bb*N_PAD, 128)  f32  (route cols 0:2, speed 2:2+d)
#   out = TriBlockDiag @ y                       (bb*N_PAD, 128)  per-batch / per-head cumsum
# ---------------------------------------------------------------------------
def _fused_heads_kernel(feat_ref, w1_ref, b1_ref, w2_ref, tri_ref, out_ref):
    bb, npad, hdim = feat_ref.shape
    x = feat_ref[...].reshape(bb * npad, hdim)                               # bf16, row-merge only
    h = jnp.dot(x, w1_ref[...], preferred_element_type=jnp.float32)         # bf16 x bf16 -> f32
    h = h + b1_ref[...]
    h = h * jax.nn.sigmoid(h)                                                # SiLU in f32 (v5e-safe)
    y = jnp.dot(h, w2_ref[...], preferred_element_type=jnp.float32)         # (bb*npad, 128)
    # block-diagonal (over batch & head) lower-triangular matmul == cumsum over the query axis
    out = jnp.dot(tri_ref[...], y,
                  preferred_element_type=jnp.float32,
                  precision=jax.lax.Precision.HIGHEST)                       # parity with f32 cumsum
    out_ref[...] = out.reshape(bb, npad, OUT_PAD)


def _run_fused_heads(feat_pad, w1_cat, b1_cat, w2_pad, tri, bb):
    b_pad, n_pad, hidden = feat_pad.shape
    two_m = w1_cat.shape[1]
    steps = b_pad // bb

    flops = int(2 * b_pad * n_pad * hidden * two_m
                + 2 * b_pad * n_pad * two_m * OUT_PAD
                + 2 * steps * (bb * n_pad) ** 2 * OUT_PAD)
    transcendentals = int(b_pad * n_pad * two_m)
    bytes_accessed = int(feat_pad.size * 2
                         + steps * (w1_cat.size * 2 + b1_cat.size * 4
                                    + w2_pad.size * 4 + tri.size * 4)
                         + b_pad * n_pad * OUT_PAD * 4)

    return pl.pallas_call(
        _fused_heads_kernel,
        out_shape=jax.ShapeDtypeStruct((b_pad, n_pad, OUT_PAD), jnp.float32),
        grid=(steps,),
        in_specs=[
            pl.BlockSpec((bb, n_pad, hidden), lambda i: (i, 0, 0)),
            pl.BlockSpec((hidden, two_m), lambda i: (0, 0)),
            pl.BlockSpec((1, two_m), lambda i: (0, 0)),
            pl.BlockSpec((two_m, OUT_PAD), lambda i: (0, 0)),
            pl.BlockSpec((bb * n_pad, bb * n_pad), lambda i: (0, 0)),
        ],
        out_specs=pl.BlockSpec((bb, n_pad, OUT_PAD), lambda i: (i, 0, 0)),
        compiler_params=pltpu.CompilerParams(dimension_semantics=("parallel",)),
        cost_estimate=pl.CostEstimate(flops=flops,
                                      transcendentals=transcendentals,
                                      bytes_accessed=bytes_accessed),
    )(feat_pad, w1_cat, b1_cat, w2_pad, tri)


@functools.lru_cache(maxsize=None)
def _build_tri_np(bb, n_pad, sizes):
    """Host-side (bb*n_pad, bb*n_pad) f32 lower-tri mask, block-diagonal over batch tile & head.

    Pad rows/cols (positions >= sum(sizes) within each batch block) are exactly zero, so zero-padded
    feature rows / padded batches can never leak into the rows that are later sliced out.
    """
    sizes = tuple(int(s) for s in sizes)
    per = np.zeros((n_pad, n_pad), dtype=np.float32)
    off = 0
    for s in sizes:
        per[off:off + s, off:off + s] = np.tril(np.ones((s, s), dtype=np.float32))
        off += s
    tri = np.zeros((bb * n_pad, bb * n_pad), dtype=np.float32)
    for b in range(bb):
        tri[b * n_pad:(b + 1) * n_pad, b * n_pad:(b + 1) * n_pad] = per
    return tri


# ---------------------------------------------------------------------------
# Module-equivalent container
# ---------------------------------------------------------------------------
class DrivingAdaptorPallas:
    def __init__(self, hidden_size, mlp_dim=64, predict_route_as_wps=True, speed_wps_mode="2d",
                 key=jax.random.PRNGKey(0)):
        assert predict_route_as_wps, "demo configured with route head enabled"
        if speed_wps_mode == "2d":
            speed_dim = 2
        elif speed_wps_mode == "1d":
            speed_dim = 1
        else:
            raise ValueError(f"speed_wps_mode must be '1d' or '2d', not {speed_wps_mode}")
        self.speed_dim = speed_dim
        self.mlp_dim = mlp_dim

        self.future_waypoints = 20
        self.future_speed_waypoints = 10
        self.order = ["route", "speed_wps"]
        self.sizes = {"route": self.future_waypoints, "speed_wps": self.future_speed_waypoints}
        self.n_total = self.future_waypoints + self.future_speed_waypoints
        assert self.n_total <= N_PAD

        ks = jax.random.split(key, 10)

        def lin_w(k, fan_in, fan_out):
            bound = 1.0 / jnp.sqrt(fan_in)
            return jax.random.uniform(k, (fan_in, fan_out), jnp.float32, -bound, bound)

        # route head params (Linear(H, M) -> SiLU -> Linear(M, 2, bias=False))
        self.query_embeds_wps = 0.02 * jax.random.normal(
            ks[0], (1, self.future_waypoints, hidden_size), jnp.float32)
        self.route_w1 = lin_w(ks[1], hidden_size, mlp_dim)
        self.route_b1 = jax.random.uniform(ks[2], (mlp_dim,), jnp.float32,
                                           -1.0 / jnp.sqrt(hidden_size), 1.0 / jnp.sqrt(hidden_size))
        self.route_w2 = lin_w(ks[3], mlp_dim, 2)

        # speed head params
        self.query_embeds_speed = 0.02 * jax.random.normal(
            ks[4], (1, self.future_speed_waypoints, hidden_size), jnp.float32)
        self.speed_w1 = lin_w(ks[5], hidden_size, mlp_dim)
        self.speed_b1 = jax.random.uniform(ks[6], (mlp_dim,), jnp.float32,
                                           -1.0 / jnp.sqrt(hidden_size), 1.0 / jnp.sqrt(hidden_size))
        self.speed_w2 = lin_w(ks[7], mlp_dim, speed_dim)

        # concatenated query embeddings (route first, then speed — matches self.order)
        self.queries_concat = jnp.concatenate([self.query_embeds_wps, self.query_embeds_speed], axis=1)

        # --- fused / packed weights for the single-kernel get_predictions ---
        # W1 concatenated along the output dim, stored bf16 -> single-pass lane-dense MXU matmul.
        self.w1_cat = jnp.concatenate([self.route_w1, self.speed_w1], axis=1).astype(jnp.bfloat16)
        self.b1_cat = jnp.concatenate([self.route_b1, self.speed_b1]).reshape(1, -1)     # (1, 2M) f32
        # Block-diagonal W2, zero-padded to OUT_PAD lanes so the kernel's output store is lane-dense.
        w2_pad = jnp.zeros((2 * mlp_dim, OUT_PAD), jnp.float32)
        w2_pad = w2_pad.at[:mlp_dim, 0:2].set(self.route_w2)
        w2_pad = w2_pad.at[mlp_dim:, 2:2 + speed_dim].set(self.speed_w2)
        self.w2_pad = w2_pad

    # -- forward(): broadcast query embeddings across batch (plain JAX — pure data movement) --
    def forward(self, camera_images):
        b = camera_images.shape[0]
        inputs = jnp.broadcast_to(self.queries_concat, (b, self.n_total, self.queries_concat.shape[-1]))
        inputs_mask = jnp.ones((b, self.n_total), dtype=jnp.bool_)   # torch.ones_like(..., bool)
        return {"inputs": inputs, "inputs_mask": inputs_mask}

    # -- get_predictions(): both heads + cumsum in one batch-gridded Pallas kernel --
    def get_predictions(self, features):
        b, n_total, hidden = features.shape
        assert n_total == self.n_total

        # batch tile: at most MAX_BATCH_TILE batches (256 rows) per grid step
        bb = min(b, MAX_BATCH_TILE)
        b_pad = ((b + bb - 1) // bb) * bb

        # bf16 features, zero-padded to (b_pad, N_PAD, H): pad rows/batches are masked out by tri
        feat_pad = jnp.zeros((b_pad, N_PAD, hidden), jnp.bfloat16)
        feat_pad = feat_pad.at[:b, :n_total, :].set(features.astype(jnp.bfloat16))

        tri = jnp.asarray(_build_tri_np(bb, N_PAD,
                                        (self.future_waypoints, self.future_speed_waypoints)))

        cum = _run_fused_heads(feat_pad, self.w1_cat, self.b1_cat, self.w2_pad, tri, bb)
        cum = cum[:b]                                                     # trim batch padding

        preds = {
            "route": cum[:, :self.future_waypoints, 0:2],
            "speed_wps": cum[:, self.future_waypoints:self.n_total, 2:2 + self.speed_dim],
        }
        return preds

    # TODO(synk): compute_loss (MSE vs labels) is training-only and left to plain JAX outside the kernel.


# ---------------------------------------------------------------------------
# Pure-JAX references for correctness checking
# ---------------------------------------------------------------------------
def _ref_head_bf16(feat, w1, b1, w2):
    """Matches the kernel's numerics: bf16 first matmul, f32 everything else."""
    h = jnp.dot(feat.astype(jnp.bfloat16), w1.astype(jnp.bfloat16),
                preferred_element_type=jnp.float32) + b1
    h = h * jax.nn.sigmoid(h)
    return jnp.cumsum(jnp.dot(h, w2, preferred_element_type=jnp.float32), axis=1)


def _ref_head_f32(feat, w1, b1, w2):
    """Full-f32 torch-semantics reference (looser tolerance vs the bf16 kernel)."""
    h = feat @ w1 + b1
    h = h * jax.nn.sigmoid(h)
    return jnp.cumsum(h @ w2, axis=1)


if __name__ == "__main__":
    hidden = 32
    mlp_dim = 64
    batch = 2

    key = jax.random.PRNGKey(0)
    k_img, k_feat, k_param = jax.random.split(key, 3)

    adaptor = DrivingAdaptorPallas(hidden, mlp_dim=mlp_dim, predict_route_as_wps=True,
                                   speed_wps_mode="2d", key=k_param)

    # camera_images only supplies the batch size (NCHW; this module has no conv)
    camera_images = jax.random.normal(k_img, (batch, 3, 16, 16), jnp.float32)

    # forward(): build query inputs + mask
    out = adaptor.forward(camera_images)
    inputs = jax.block_until_ready(out["inputs"])          # (2, 30, 32)
    mask = jax.block_until_ready(out["inputs_mask"])       # (2, 30) bool

    ref_inputs = jnp.broadcast_to(adaptor.queries_concat, (batch, 30, hidden))
    assert inputs.shape == (batch, 30, hidden)
    assert jnp.allclose(inputs, ref_inputs), "forward broadcast mismatch"
    assert mask.shape == (batch, 30) and mask.dtype == jnp.bool_

    # get_predictions() on transformer-like features of the same shape
    features = jax.random.normal(k_feat, (batch, 30, hidden), jnp.float32)
    preds = adaptor.get_predictions(features)
    route = jax.block_until_ready(preds["route"])           # (2, 20, 2)
    speed = jax.block_until_ready(preds["speed_wps"])       # (2, 10, 2)
    assert route.shape == (batch, 20, 2) and speed.shape == (batch, 10, 2)

    # numerics-matched reference (bf16 first matmul, like the kernel)
    ref_route = _ref_head_bf16(features[:, :20], adaptor.route_w1, adaptor.route_b1, adaptor.route_w2)
    ref_speed = _ref_head_bf16(features[:, 20:], adaptor.speed_w1, adaptor.speed_b1, adaptor.speed_w2)
    assert jnp.allclose(route, ref_route, atol=1e-3, rtol=1e-3), "route head mismatch (bf16 ref)"
    assert jnp.allclose(speed, ref_speed, atol=1e-3, rtol=1e-3), "speed head mismatch (bf16 ref)"

    # full-f32 torch-semantics sanity check (loose tolerance for the deliberate bf16 cast)
    ref_route32 = _ref_head_f32(features[:, :20], adaptor.route_w1, adaptor.route_b1, adaptor.route_w2)
    ref_speed32 = _ref_head_f32(features[:, 20:], adaptor.speed_w1, adaptor.speed_b1, adaptor.speed_w2)
    assert jnp.allclose(route, ref_route32, atol=5e-2, rtol=5e-2), "route head mismatch (f32 ref)"
    assert jnp.allclose(speed, ref_speed32, atol=5e-2, rtol=5e-2), "speed head mismatch (f32 ref)"

    print("KERNEL_OK")
</pallas_src>

<mosaic_0001>
module attributes {stable_mosaic.version = 11 : i64} {
  func.func @_fused_heads_kernel(%arg0: i32, %arg1: memref<2x32x32xbf16, #tpu.memory_space<vmem>>, %arg2: memref<32x128xbf16, #tpu.memory_space<vmem>>, %arg3: memref<1x128xf32, #tpu.memory_space<vmem>>, %arg4: memref<128x128xf32, #tpu.memory_space<vmem>>, %arg5: memref<64x64xf32, #tpu.memory_space<vmem>>, %arg6: memref<2x32x128xf32, #tpu.memory_space<vmem>>) attributes {dimension_semantics = [#tpu.dimension_semantics<parallel>], iteration_bounds = array<i64: 1>, scalar_prefetch = 0 : i64, scratch_operands = 0 : i64, tpu.core_type = #tpu.core_type<tc>, window_params = [{transform_indices = @transform_0, window_bounds = array<i64: 2, 32, 32>}, {pipeline_mode = #tpu.pipeline_mode<synchronous>, transform_indices = @transform_1, window_bounds = array<i64: 32, 128>}, {pipeline_mode = #tpu.pipeline_mode<synchronous>, transform_indices = @transform_2, window_bounds = array<i64: 1, 128>}, {pipeline_mode = #tpu.pipeline_mode<synchronous>, transform_indices = @transform_3, window_bounds = array<i64: 128, 128>}, {pipeline_mode = #tpu.pipeline_mode<synchronous>, transform_indices = @transform_4, window_bounds = array<i64: 64, 64>}, {transform_indices = @transform_5, window_bounds = array<i64: 2, 32, 128>}]} {
    %c0 = arith.constant 0 : index
    %c0_0 = arith.constant 0 : index
    %c0_1 = arith.constant 0 : index
    %0 = vector.load %arg1[%c0, %c0_0, %c0_1] : memref<2x32x32xbf16, #tpu.memory_space<vmem>>, vector<2x32x32xbf16>
    %1 = vector.shape_cast %0 : vector<2x32x32xbf16> to vector<64x32xbf16>
    %c0_2 = arith.constant 0 : index
    %c0_3 = arith.constant 0 : index
    %2 = vector.load %arg2[%c0_2, %c0_3] : memref<32x128xbf16, #tpu.memory_space<vmem>>, vector<32x128xbf16>
    %cst = arith.constant dense<0.000000e+00> : vector<64x128xf32>
    %3 = tpu.matmul %1, %2, %cst {dimension_numbers = #tpu.dot_dimension_numbers<[1], [0], [0], [1], [0, 0, 1, 1], [], []>} : vector<64x32xbf16>, vector<32x128xbf16>, vector<64x128xf32> -> vector<64x128xf32>
    %c0_4 = arith.constant 0 : index
    %c0_5 = arith.constant 0 : index
    %4 = vector.load %arg3[%c0_4, %c0_5] : memref<1x128xf32, #tpu.memory_space<vmem>>, vector<1x128xf32>
    %5 = vector.broadcast %4 : vector<1x128xf32> to vector<64x128xf32>
    %6 = arith.addf %3, %5 : vector<64x128xf32>
    %7 = arith.negf %6 : vector<64x128xf32>
    %8 = math.exp %7 : vector<64x128xf32>
    %cst_6 = arith.constant 1.000000e+00 : f32
    %9 = vector.broadcast %cst_6 : f32 to vector<64x128xf32>
    %10 = arith.addf %9, %8 : vector<64x128xf32>
    %11 = arith.divf %9, %10 : vector<64x128xf32>
    %12 = arith.mulf %6, %11 : vector<64x128xf32>
    %c0_7 = arith.constant 0 : index
    %c0_8 = arith.constant 0 : index
    %13 = vector.load %arg4[%c0_7, %c0_8] : memref<128x128xf32, #tpu.memory_space<vmem>>, vector<128x128xf32>
    %cst_9 = arith.constant dense<0.000000e+00> : vector<64x128xf32>
    %14 = tpu.matmul %12, %13, %cst_9 {dimension_numbers = #tpu.dot_dimension_numbers<[1], [0], [0], [1], [0, 0, 1, 1], [], []>} : vector<64x128xf32>, vector<128x128xf32>, vector<64x128xf32> -> vector<64x128xf32>
    %c0_10 = arith.constant 0 : index
    %c0_11 = arith.constant 0 : index
    %15 = vector.load %arg5[%c0_10, %c0_11] : memref<64x64xf32, #tpu.memory_space<vmem>>, vector<64x64xf32>
    %cst_12 = arith.constant dense<0.000000e+00> : vector<64x128xf32>
    %16 = tpu.matmul %15, %14, %cst_12 {dimension_numbers = #tpu.dot_dimension_numbers<[1], [0], [0], [1], [0, 0, 1, 1], [], []>, precision = #tpu.contract_precision<fp32>} : vector<64x64xf32>, vector<64x128xf32>, vector<64x128xf32> -> vector<64x128xf32>
    %17 = vector.shape_cast %16 : vector<64x128xf32> to vector<2x32x128xf32>
    %c0_13 = arith.constant 0 : index
    %c0_14 = arith.constant 0 : index
    %c0_15 = arith.constant 0 : index
    %18 = vector.load %arg6[%c0_13, %c0_14, %c0_15] : memref<2x32x128xf32, #tpu.memory_space<vmem>>, vector<2x32x128xf32>
    tpu.vector_store %arg6[%c0_13, %c0_14, %c0_15], %17 {strides = array<i32>} : memref<2x32x128xf32, #tpu.memory_space<vmem>>, vector<2x32x128xf32>,
    return
  }
  func.func @transform_0(%arg0: i32) -> (i32, i32, i32) {
    %c0_i32 = arith.constant 0 : i32
    %c0_i32_0 = arith.constant 0 : i32
    %c0_i32_1 = arith.constant 0 : i32
    return %arg0, %c0_i32, %c0_i32_0 : i32, i32, i32
  }
  func.func @transform_1(%arg0: i32) -> (i32, i32) {
    %c0_i32 = arith.constant 0 : i32
    %c0_i32_0 = arith.constant 0 : i32
    %c0_i32_1 = arith.constant 0 : i32
    return %c0_i32, %c0_i32_0 : i32, i32
  }
  func.func @transform_2(%arg0: i32) -> (i32, i32) {
    %c0_i32 = arith.constant 0 : i32
    %c0_i32_0 = arith.constant 0 : i32
    %c0_i32_1 = arith.constant 0 : i32
    return %c0_i32, %c0_i32_0 : i32, i32
  }
  func.func @transform_3(%arg0: i32) -> (i32, i32) {
    %c0_i32 = arith.constant 0 : i32
    %c0_i32_0 = arith.constant 0 : i32
    %c0_i32_1 = arith.constant 0 : i32
    return %c0_i32, %c0_i32_0 : i32, i32
  }
  func.func @transform_4(%arg0: i32) -> (i32, i32) {
    %c0_i32 = arith.constant 0 : i32
    %c0_i32_0 = arith.constant 0 : i32
    %c0_i32_1 = arith.constant 0 : i32
    return %c0_i32, %c0_i32_0 : i32, i32
  }
  func.func @transform_5(%arg0: i32) -> (i32, i32, i32) {
    %c0_i32 = arith.constant 0 : i32
    %c0_i32_0 = arith.constant 0 : i32
    %c0_i32_1 = arith.constant 0 : i32
    return %arg0, %c0_i32, %c0_i32_0 : i32, i32, i32
  }
}

</mosaic_0001>

<bundles_post_ra>
// kernel: tpu_custom_call.1
= control target key start
LH: loop header
LB: loop body
LE: loop exit
PB: predicated region body
PF: predicated region fallthrough
CT: control target
= control target key end

     0   :  { %10 = vsyncpa [#allocation3], 0  ;;  %s2304_s0 = inlined_call_operand.hbm [shape: bf16[2,32,32], index: 0, kind: input, shape index: {}]   ;;  %s2305_s1 = inlined_call_operand.hbm [shape: bf16[32,128], index: 1, kind: input, shape index: {}]   ;;  %s2306_s2 = inlined_call_operand.vmem [shape: f32[1,128], index: 2, kind: input, shape index: {}]   ;;  %s2307_s3 = inlined_call_operand.hbm [shape: f32[128,128], index: 3, kind: input, shape index: {}]   ;;  %s2308_s4 = inlined_call_operand.hbm [shape: f32[64,64], index: 4, kind: input, shape index: {}]   ;;  %s2309_s5 = inlined_call_operand.hbm [shape: f32[2,32,128], index: 5, kind: output, shape index: {}]  }
   0x1   :  { %11 = vsyncpa [#allocation6], 0 }
   0x2   :  { %12 = vsyncpa [#allocation9], 0 }
   0x3   :  { %13 = vsyncpa [#allocation4], 0  ;;  %s1991_s18 = smov [#allocation5]   ;;  %s1992_s20 = smov [#allocation2]  }
   0x4   :  { %s31_s19 = sshll.u32 %s1991_s18, 4  ;;  %s19_s21 = sshll.u32 %s1992_s20, 4  ;;  %s32_s19 = int_to_ptr.vmem [resolvable:$true] %s31_s19  ;;  %s2030_s21 = int_to_ptr.vmem [resolvable:$true] %s19_s21 }
   0x5   :  { %s1873_s24 = scalar_lea.hbm %s2305_s1, 256 }
   0x6   :  { %p1874_p0 = scmp.ne.s32.totalorder %s2305_s1, %s1873_s24  ;;  %p1877_p1 = scmp.lt.u32.totalorder %s1873_s24, %s2305_s1 }
   0x8   :  { %p1879_p2 = pnand %p1877_p1, %p1874_p0 }
   0xa   :  { %1882 = shalt.err (!%p1879_p2)
}
   0xb   :  { %s1883_s29 = scalar_lea.vmem %s32_s19, 256  ;;  %p1888_p4 = scmp.lt.s32.totalorder %s32_s19, %s32_s19 }
   0xc   :  { %p1884_p3 = scmp.ne.s32.totalorder %s32_s19, %s1883_s29  ;;  %p1889_p5 = scmp.lt.s32.totalorder %s1883_s29, %s1883_s29 }
   0xe   :  { %p1890_p6 = por %p1889_p5, %p1888_p4 }
  0x10   :  { %p1891_p7 = pnand %p1890_p6, %p1884_p3 }
  0x12   :  { %1894 = shalt.err (!%p1891_p7)
}
  0x13   :  { %s1993_s30 = smov 64   ;;  %s1994_s6 = smov 4  }
  0x14   :  { %37 = dma.hbm_to_vmem [thread:$0]  %s2305_s1, 256, %s32_s19, [#allocation6], %s1993_s30, %s1993_s30, %s1994_s6  }
  0x15   :  { %s1895_s11 = scalar_lea.hbm %s2304_s0, 512 }
  0x16   :  { %p1896_p8 = scmp.ne.s32.totalorder %s2304_s0, %s1895_s11  ;;  %p1899_p9 = scmp.lt.u32.totalorder %s1895_s11, %s2304_s0 }
  0x18   :  { %p1901_p10 = pnand %p1899_p9, %p1896_p8 }
  0x1a   :  { %1904 = shalt.err (!%p1901_p10)
}
  0x1b   :  { %s1905_s16 = scalar_lea.vmem %s2030_s21, 512  ;;  %p1910_p12 = scmp.lt.s32.totalorder %s2030_s21, %s2030_s21 }
  0x1c   :  { %p1906_p11 = scmp.ne.s32.totalorder %s2030_s21, %s1905_s16  ;;  %p1911_p13 = scmp.lt.s32.totalorder %s1905_s16, %s1905_s16 }
  0x1e   :  { %p1912_p0 = por %p1911_p13, %p1910_p12 }
  0x20   :  { %p1913_p1 = pnand %p1912_p0, %p1906_p11 }
  0x22   :  { %1916 = shalt.err (!%p1913_p1)
}
  0x23   :  { %25 = dma.hbm_to_vmem [thread:$0]  %s2304_s0, 512, %s2030_s21, [#allocation3], %s1993_s30, %s1993_s30, %s1994_s6  }
  0x24   :  { %s1995_s18 = smov [#allocation7]   ;;  %s1917_s23 = scalar_lea.hbm %s2307_s3, 2048 }
  0x25   :  { %s45_s19 = sshll.u32 %s1995_s18, 4  ;;  %p1918_p2 = scmp.ne.s32.totalorder %s2307_s3, %s1917_s23  ;;  %s46_s19 = int_to_ptr.vmem [resolvable:$true] %s45_s19 }
  0x26   :  { %p1921_p3 = scmp.lt.u32.totalorder %s1917_s23, %s2307_s3 }
  0x28   :  { %p1923_p4 = pnand %p1921_p3, %p1918_p2 }
  0x2a   :  { %1926 = shalt.err (!%p1923_p4)
}
  0x2b   :  { %s1927_s28 = scalar_lea.vmem %s46_s19, 2048  ;;  %p1932_p6 = scmp.lt.s32.totalorder %s46_s19, %s46_s19 }
  0x2c   :  { %p1928_p5 = scmp.ne.s32.totalorder %s46_s19, %s1927_s28  ;;  %p1933_p7 = scmp.lt.s32.totalorder %s1927_s28, %s1927_s28 }
  0x2e   :  { %p1934_p8 = por %p1933_p7, %p1932_p6 }
  0x30   :  { %p1935_p9 = pnand %p1934_p8, %p1928_p5 }
  0x32   :  { %1938 = shalt.err (!%p1935_p9)
}
  0x33   :  { %s1996_s0 = smov 128   ;;  %s1997_s21 = smov 8  }
  0x34   :  { %51 = dma.hbm_to_vmem [thread:$0]  %s2307_s3, 2048, %s46_s19, [#allocation6], %s1996_s0, %s1996_s0, %s1997_s21  }
  0x35   :  { %s1998_s6 = smov [#allocation8]   ;;  %s1939_s10 = scalar_lea.hbm %s2308_s4, 1024 }
  0x36   :  { %s57_s7 = sshll.u32 %s1998_s6, 4  ;;  %p1940_p10 = scmp.ne.s32.totalorder %s2308_s4, %s1939_s10  ;;  %s58_s7 = int_to_ptr.vmem [resolvable:$true] %s57_s7 }
  0x37   :  { %p1943_p11 = scmp.lt.u32.totalorder %s1939_s10, %s2308_s4 }
  0x39   :  { %p1945_p12 = pnand %p1943_p11, %p1940_p10 }
  0x3b   :  { %1948 = shalt.err (!%p1945_p12)
}
  0x3c   :  { %s1949_s15 = scalar_lea.vmem %s58_s7, 1024  ;;  %p1954_p0 = scmp.lt.s32.totalorder %s58_s7, %s58_s7 }
  0x3d   :  { %p1950_p13 = scmp.ne.s32.totalorder %s58_s7, %s1949_s15  ;;  %p1955_p1 = scmp.lt.s32.totalorder %s1949_s15, %s1949_s15 }
  0x3f   :  { %p1956_p2 = por %p1955_p1, %p1954_p0 }
  0x41   :  { %p1957_p3 = pnand %p1956_p2, %p1950_p13 }
  0x43   :  { %1960 = shalt.err (!%p1957_p3)
}
  0x44   :  { %63 = dma.hbm_to_vmem [thread:$0]  %s2308_s4, 1024, %s58_s7, [#allocation9], %s1996_s0, %s1996_s0, %s1997_s21  }
  0x45   :  { %1983 = dma.done.wait [#allocation3], 512  }
  0x46   :  { %1984 = vsyncadd [#allocation3], 4294966784 }
  0x47   :  { %1985 = dma.done.wait [#allocation6], 2304  }
  0x48   :  { %1986 = vsyncadd [#allocation6], 4294964992 }
  0x49   :  { %1987 = dma.done.wait [#allocation9], 1024  }
  0x4a   :  { %1988 = vsyncadd [#allocation9], 4294966272  ;;  %v1835_v0 = vld [vmem:[#allocation5] sm:$0xff]   ;;  %v1836_v1 = vld [vmem:[#allocation5 + $0x8] sm:$0xff]   ;;  %vm128_vm0 = vcmask 261120   ;;  %vm391_vm1 = vcmask 523264  }
  0x4b   :  { %1426 = vmatprep.subr.bf16.mxu0 %v1835_v0  ;;  %v1837_v2 = vld [vmem:[#allocation2] sm:$0xff]   ;;  %v1838_v3 = vld [vmem:[#allocation2 + $0x8] sm:$0xff]   ;;  %v1839_v4 = vld [vmem:[#allocation2 + $0x10] sm:$0xff]  }
  0x4c   :  { %1427 = vmatpush3.bf16.msra.mxu0 %v1835_v0  ;;  %1430 = vmatprep.mubr.msk.bf16.mxu0 %vm128_vm0, %v1837_v2  ;;  %v1840_v5 = vld [vmem:[#allocation2 + $0x18] sm:$0xff]   ;;  %v262_v6 = vld [vmem:[#allocation7] sm:$0xff]  ;;  %v264_v9 = vld [vmem:[#allocation7 + $0x10] sm:$0xff] }
  0x4d   :  { %1428 = vmatprep.subr.bf16.mxu0 %v1836_v1  ;;  %v263_v7 = vld [vmem:[#allocation7 + $0x8] sm:$0xff]  ;;  %v265_v10 = vld [vmem:[#allocation7 + $0x18] sm:$0xff]  ;;  %v266_v12 = vld [vmem:[#allocation7 + $0x20] sm:$0xff] }
  0x4e   :  { %v1650_v8 = vpack.c.bf16 %v263_v7, %v262_v6  ;;  %v1654_v11 = vpack.c.bf16 %v265_v10, %v264_v9  ;;  %v267_v13 = vld [vmem:[#allocation7 + $0x28] sm:$0xff]  ;;  %v268_v15 = vld [vmem:[#allocation7 + $0x30] sm:$0xff]  ;;  %v269_v16 = vld [vmem:[#allocation7 + $0x38] sm:$0xff] }
  0x4f   :  { %v1658_v14 = vpack.c.bf16 %v267_v13, %v266_v12  ;;  %v1662_v17 = vpack.c.bf16 %v269_v16, %v268_v15  ;;  %v270_v18 = vld [vmem:[#allocation7 + $0x40] sm:$0xff]  ;;  %v271_v19 = vld [vmem:[#allocation7 + $0x48] sm:$0xff]  ;;  %v272_v21 = vld [vmem:[#allocation7 + $0x50] sm:$0xff] }
  0x50   :  { %1429 = vmatpush3.bf16.msra.mxu0 %v1836_v1  ;;  %1651 = vmatprep.subr.bf16.mxu1 %v1650_v8  ;;  %v1666_v20 = vpack.c.bf16 %v271_v19, %v270_v18  ;;  %v273_v22 = vld [vmem:[#allocation7 + $0x58] sm:$0xff]  ;;  %v274_v24 = vld [vmem:[#allocation7 + $0x60] sm:$0xff]  ;;  %v275_v25 = vld [vmem:[#allocation7 + $0x68] sm:$0xff] }
  0x51   :  { %1653 = vmatpush3.bf16.msra.mxu1 %v1650_v8  ;;  %v1670_v23 = vpack.c.bf16 %v273_v22, %v272_v21  ;;  %v1674_v26 = vpack.c.bf16 %v275_v25, %v274_v24  ;;  %v276_v27 = vld [vmem:[#allocation7 + $0x70] sm:$0xff]  ;;  %v277_v28 = vld [vmem:[#allocation7 + $0x78] sm:$0xff] }
  0x52   :  { %1655 = vmatprep.subr.bf16.mxu1 %v1654_v11  ;;  %v1678_v29 = vpack.c.bf16 %v277_v28, %v276_v27  ;;  %v1281_v30 = vld [vmem:[%s2306_s2] ss:$0 sm:$0xff]  ;;  %s1999_s2 = smov [#allocation10]  }
  0x53   :  { %1431 = vmatmul.mubr.msk.bf16.vlgmr.msra.gmra.mrb[0].mxu0 %vm128_vm0, %v1838_v3  ;;  %s1267_s17 = sshll.u32 %s1999_s2, 4  ;;  %s1268_s17 = int_to_ptr.vmem [resolvable:$true] %s1267_s17 }
  0x54   :  { %1434 = vmatprep.mubr.msk.bf16.mxu0 %vm128_vm0, %v1839_v4  ;;  %s1961_s18 = scalar_lea.vmem %s1268_s17, 1024  ;;  %p1966_p5 = scmp.lt.s32.totalorder %s1268_s17, %s1268_s17 }
  0x55   :  { %1657 = vmatpush3.bf16.msra.mxu1 %v1654_v11  ;;  %p1962_p4 = scmp.ne.s32.totalorder %s1268_s17, %s1961_s18  ;;  %p1967_p6 = scmp.lt.s32.totalorder %s1961_s18, %s1961_s18 }
  0x56   :  { %1659 = vmatprep.subr.bf16.mxu1 %v1658_v14 }
  0x57   :  { %p1968_p7 = por %p1967_p6, %p1966_p5 }
  0x59   :  { %1661 = vmatpush3.bf16.msra.mxu1 %v1658_v14  ;;  %p1969_p8 = pnand %p1968_p7, %p1962_p4 }
  0x5a   :  { %1663 = vmatprep.subr.bf16.mxu1 %v1662_v17 }
  0x5b   :  { %1435 = vmatmul.mubr.msk.bf16.gmra.mrb[4].mxu0 %vm128_vm0, %v1840_v5 }
  0x5d   :  { %1665 = vmatpush3.bf16.msra.mxu1 %v1662_v17 }
  0x5e   :  { %1667 = vmatprep.subr.bf16.mxu1 %v1666_v20 }
  0x61   :  { %1669 = vmatpush3.bf16.msra.mxu1 %v1666_v20 }
  0x62   :  { %1671 = vmatprep.subr.bf16.mxu1 %v1670_v23 }
  0x65   :  { %1673 = vmatpush3.bf16.msra.mxu1 %v1670_v23  ;;  %v383_v23 = vld [vmem:[#allocation8] sm:$0xff] }
  0x66   :  { %1675 = vmatprep.subr.bf16.mxu1 %v1674_v26  ;;  %v393_v24 = vsel %vm391_vm1, %v383_v23, 0 }
  0x67   :  { %v2095_v25 = vand.u32 4294901760, %v393_v24 }
  0x69   :  { %1677 = vmatpush3.bf16.msra.mxu1 %v1674_v26  ;;  %v2098_v26 = vsub.f32 %v393_v24, %v2095_v25 }
  0x6a   :  { %1679 = vmatprep.subr.bf16.mxu1 %v1678_v29 }
  0x6b   :  { %v491_v27 = vand.u32 4294901760, %v2098_v26  ;;  %1554 = vmatprep.mubr.f32.mxu0 %v2098_v26 }
  0x6d   :  { %1681 = vmatpush3.bf16.msra.mxu1 %v1678_v29  ;;  %v492_v28 = vsub.f32 %v2098_v26, %v491_v27 }
  0x6f   :  { %v493_v29 = vand.u32 4294901760, %v492_v28 }
 0x126   :  { %v1432_v31 = vpop.f32.mrb[0].mxu0 }
 0x127   :  { %v184_v32 = vadd.f32 %v1432_v31, %v1281_v30  ;;  %v175_v33 = vpop.f32.mrb[1].mxu0 }
 0x128   :  { %v176_v34 = vadd.f32 %v1281_v30, %v175_v33  ;;  %v1433_v35 = vpop.f32.mrb[2].mxu0 }
 0x129   :  { %v1294_v36 = vmul.f32 -1.442695, %v184_v32  ;;  %v187_v37 = vadd.f32 %v1433_v35, %v1281_v30  ;;  %v178_v38 = vpop.f32.mrb[3].mxu0 }
 0x12a   :  { %v1292_v39 = vmul.f32 -1.442695, %v176_v34  ;;  %v179_v40 = vadd.f32 %v1281_v30, %v178_v38 }
 0x12b   :  { %1841 = vpow2.f32 %v1294_v36  ;;  %v1295_v41 = vmul.f32 -1.442695, %v187_v37 }
 0x12c   :  { %1843 = vpow2.f32 %v1292_v39  ;;  %v1293_v42 = vmul.f32 -1.442695, %v179_v40 }
 0x12d   :  { %1845 = vpow2.f32 %v1295_v41 }
 0x12e   :  { %1847 = vpow2.f32 %v1293_v42  ;;  %v1436_v43 = vpop.f32.mrb[4].mxu0 }
 0x12f   :  { %v200_v44 = vadd.f32 %v1436_v43, %v1281_v30  ;;  %v191_v45 = vpop.f32.mrb[5].mxu0 }
 0x130   :  { %v192_v46 = vadd.f32 %v1281_v30, %v191_v45  ;;  %v1437_v47 = vpop.f32.mrb[6].mxu0  ;;  %v388_v45 = vld [vmem:[#allocation8 + $0x28] sm:$0xff] }
 0x131   :  { %v1298_v48 = vmul.f32 -1.442695, %v200_v44  ;;  %v203_v49 = vadd.f32 %v1437_v47, %v1281_v30  ;;  %v194_v50 = vpop.f32.mrb[7].mxu0 }
 0x132   :  { %v1296_v51 = vmul.f32 -1.442695, %v192_v46  ;;  %v195_v52 = vadd.f32 %v1281_v30, %v194_v50  ;;  %v384_v30 = vld [vmem:[#allocation8 + $0x8] sm:$0xff] }
 0x133   :  { %1849 = vpow2.f32 %v1298_v48  ;;  %v1299_v53 = vmul.f32 -1.442695, %v203_v49  ;;  %v396_v31 = vsel %vm391_vm1, %v384_v30, 0 }
 0x134   :  { %1851 = vpow2.f32 %v1296_v51  ;;  %v1297_v54 = vmul.f32 -1.442695, %v195_v52  ;;  %v2106_v33 = vand.u32 4294901760, %v396_v31 }
 0x135   :  { %v1842_v55 = vpop.eup %1841  ;;  %1853 = vpow2.f32 %v1299_v53 }
 0x136   :  { %v1844_v56 = vpop.eup %1843  ;;  %v232_v57 = vadd.f32 1.0, %v1842_v55  ;;  %1855 = vpow2.f32 %v1297_v54 }
 0x137   :  { %v1846_v58 = vpop.eup %1845  ;;  %v230_v59 = vadd.f32 1.0, %v1844_v56 }
 0x138   :  { %v1848_v60 = vpop.eup %1847  ;;  %v233_v61 = vadd.f32 1.0, %v1846_v58 }
 0x139   :  { %1857 = vrcp.f32 %v230_v59  ;;  %v231_v62 = vadd.f32 1.0, %v1848_v60 }
 0x13a   :  { %1859 = vrcp.f32 %v232_v57 }
 0x13b   :  { %1861 = vrcp.f32 %v231_v62  ;;  %v390_v62 = vld [vmem:[#allocation8 + $0x38] sm:$0xff] }
 0x13c   :  { %1863 = vrcp.f32 %v233_v61  ;;  %v389_v61 = vld [vmem:[#allocation8 + $0x30] sm:$0xff] }
 0x13d   :  { %v1850_v63 = vpop.eup %1849 }
 0x13e   :  { %v1852_v0 = vpop.eup %1851  ;;  %v236_v1 = vadd.f32 1.0, %v1850_v63 }
 0x13f   :  { %v1854_v2 = vpop.eup %1853  ;;  %v234_v3 = vadd.f32 1.0, %v1852_v0 }
 0x140   :  { %v1856_v4 = vpop.eup %1855  ;;  %v237_v5 = vadd.f32 1.0, %v1854_v2 }
 0x141   :  { %1865 = vrcp.f32 %v234_v3  ;;  %v235_v6 = vadd.f32 1.0, %v1856_v4 }
 0x142   :  { %1867 = vrcp.f32 %v236_v1 }
 0x143   :  { %v1858_v7 = vpop.eup %1857  ;;  %1869 = vrcp.f32 %v235_v6 }
 0x144   :  { %v1860_v8 = vpop.eup %1859  ;;  %v254_v9 = vmul.f32 %v1858_v7, %v176_v34  ;;  %1871 = vrcp.f32 %v237_v5  ;;  %v386_v34 = vld [vmem:[#allocation8 + $0x18] sm:$0xff] }
 0x145   :  { %v1862_v10 = vpop.eup %1861  ;;  %v256_v13 = vmul.f32 %v1860_v8, %v184_v32  ;;  %v385_v32 = vld [vmem:[#allocation8 + $0x10] sm:$0xff]  ;;  %v402_v36 = vsel %vm391_vm1, %v386_v34, 0 }
 0x146   :  { %v255_v11 = vmul.f32 %v1862_v10, %v179_v40  ;;  %1470 = vmatprep.mubr.f32.mxu1 %v254_v9  ;;  %v1864_v12 = vpop.eup %1863  ;;  %v399_v35 = vsel %vm391_vm1, %v385_v32, 0  ;;  %v2115_v39 = vand.u32 4294901760, %v402_v36  ;;  %v387_v40 = vld [vmem:[#allocation8 + $0x20] sm:$0xff]  ;;  %v411_v10 = vsel %vm391_vm1, %v389_v61, 0 }
 0x147   :  { %v257_v14 = vmul.f32 %v1864_v12, %v187_v37  ;;  %v2111_v37 = vsub.f32 %v396_v31, %v2106_v33  ;;  %v2113_v38 = vand.u32 4294901760, %v399_v35  ;;  %v2166_v31 = vand.u32 4294901760, %v411_v10 }
 0x148   :  { %1471 = vmatmul.mubr.f32.vlgmr.msra.gmra.mrb[0].mxu1 %v255_v11  ;;  %v2122_v43 = vsub.f32 %v402_v36, %v2115_v39  ;;  %v414_v11 = vsel %vm391_vm1, %v390_v62, 0 }
 0x149   :  { %1473 = vmatprep.mubr.f32.mxu1 %v256_v13  ;;  %v501_v41 = vand.u32 4294901760, %v2111_v37  ;;  %v2119_v42 = vsub.f32 %v399_v35, %v2113_v38  ;;  %v2168_v32 = vand.u32 4294901760, %v414_v11 }
 0x14a   :  { %v521_v54 = vand.u32 4294901760, %v2122_v43 }
 0x14b   :  { %v1866_v15 = vpop.eup %1865  ;;  %v2128_v47 = vsub.f32 %v2111_v37, %v501_v41  ;;  %v511_v50 = vand.u32 4294901760, %v2119_v42 }
 0x14c   :  { %v1868_v16 = vpop.eup %1867  ;;  %v258_v17 = vmul.f32 %v1866_v15, %v192_v46  ;;  %1474 = vmatmul.mubr.f32.gmra.mrb[2].mxu1 %v257_v14  ;;  %v2152_v7 = vsub.f32 %v2122_v43, %v521_v54 }
 0x14d   :  { %v1870_v18 = vpop.eup %1869  ;;  %v260_v21 = vmul.f32 %v1868_v16, %v200_v44  ;;  %v405_v44 = vsel %vm391_vm1, %v387_v40, 0  ;;  %v503_v59 = vand.u32 4294901760, %v2128_v47  ;;  %v2143_v2 = vsub.f32 %v2119_v42, %v511_v50 }
 0x14e   :  { %v259_v19 = vmul.f32 %v1870_v18, %v195_v52  ;;  %1476 = vmatprep.mubr.f32.mxu1 %v258_v17  ;;  %v1872_v20 = vpop.eup %1871  ;;  %v2131_v51 = vand.u32 4294901760, %v405_v44  ;;  %v408_v52 = vsel %vm391_vm1, %v388_v45, 0 }
 0x14f   :  { %v261_v22 = vmul.f32 %v1872_v20, %v203_v49  ;;  %v2138_v60 = vand.u32 4294901760, %v408_v52 }
 0x150   :  { %1477 = vmatmul.mubr.f32.gmra.mrb[4].mxu1 %v259_v19  ;;  %v2146_v3 = vsub.f32 %v405_v44, %v2131_v51 }
 0x151   :  { %1479 = vmatprep.mubr.f32.mxu1 %v260_v21  ;;  %v2162_v21 = vsub.f32 %v408_v52, %v2138_v60 }
 0x154   :  { %1480 = vmatmul.mubr.f32.gmra.mrb[6].mxu1 %v261_v22 }
 0x155   :  { %1498 = vmatprep.mubr.f32.mxu1 %v493_v29 }
 0x21b   :  { %v1472_v46 = vpop.f32.mrb[0].mxu1 }
 0x21c   :  { %v420_v48 = vand.u32 4294901760, %v1472_v46  ;;  %v344_v49 = vpop.f32.mrb[1].mxu1 }
 0x21d   :  { %v417_v53 = vand.u32 4294901760, %v344_v49 }
 0x21e   :  { %v578_v55 = vsub.f32 %v1472_v46, %v420_v48 }
 0x21f   :  { %v2135_v56 = vpack.c.bf16 %v420_v48, %v417_v53  ;;  %v571_v57 = vsub.f32 %v344_v49, %v417_v53  ;;  %v1475_v58 = vpop.f32.mrb[2].mxu1 }
 0x220   :  { %v579_v63 = vand.u32 4294901760, %v578_v55  ;;  %v426_v0 = vand.u32 4294901760, %v1475_v58  ;;  %v354_v1 = vpop.f32.mrb[3].mxu1 }
 0x221   :  { %v572_v4 = vand.u32 4294901760, %v571_v57  ;;  %v423_v5 = vand.u32 4294901760, %v354_v1  ;;  %1683 = vmatprep.subr.bf16.mxu1 %v2135_v56  ;;  %v1714_v6 = vpack.c.bf16 %v578_v55, %v571_v57 }
 0x222   :  { %v580_v8 = vsub.f32 %v578_v55, %v579_v63  ;;  %v592_v9 = vsub.f32 %v1475_v58, %v426_v0  ;;  %1685 = vmatpush3.bf16.msra.mxu1 %v2135_v56 }
 0x223   :  { %v573_v12 = vsub.f32 %v571_v57, %v572_v4  ;;  %v2157_v13 = vpack.c.bf16 %v426_v0, %v423_v5  ;;  %v585_v14 = vsub.f32 %v354_v1, %v423_v5  ;;  %v1478_v15 = vpop.f32.mrb[4].mxu1  ;;  %1715 = vmatprep.subr.bf16.mxu0 %v1714_v6  ;;  %v2159_v16 = vpack.c.bf16 %v579_v63, %v572_v4 }
 0x224   :  { %v593_v17 = vand.u32 4294901760, %v592_v9  ;;  %v432_v18 = vand.u32 4294901760, %v1478_v15  ;;  %v364_v19 = vpop.f32.mrb[5].mxu1  ;;  %1717 = vmatpush3.bf16.msra.mxu0 %v1714_v6  ;;  %v581_v20 = vand.u32 4294901760, %v580_v8  ;;  %v531_v63 = vand.u32 4294901760, %v2146_v3 }
 0x225   :  { %v586_v22 = vand.u32 4294901760, %v585_v14  ;;  %v429_v23 = vand.u32 4294901760, %v364_v19  ;;  %1687 = vmatprep.subr.bf16.mxu1 %v2157_v13  ;;  %v1718_v24 = vpack.c.bf16 %v592_v9, %v585_v14  ;;  %v574_v28 = vand.u32 4294901760, %v573_v12 }
 0x226   :  { %v594_v29 = vsub.f32 %v592_v9, %v593_v17  ;;  %v606_v30 = vsub.f32 %v1478_v15, %v432_v18  ;;  %1689 = vmatpush3.bf16.msra.mxu1 %v2157_v13  ;;  %v2178_v0 = vsub.f32 %v411_v10, %v2166_v31  ;;  %v541_v12 = vand.u32 4294901760, %v2162_v21 }
 0x227   :  { %v587_v34 = vsub.f32 %v585_v14, %v586_v22  ;;  %v2170_v35 = vpack.c.bf16 %v432_v18, %v429_v23  ;;  %v599_v36 = vsub.f32 %v364_v19, %v429_v23  ;;  %v1481_v40 = vpop.f32.mrb[6].mxu1  ;;  %1719 = vmatprep.subr.bf16.mxu0 %v1718_v24  ;;  %v1698_v44 = vpack.c.bf16 %v581_v20, %v574_v28 }
 0x228   :  { %v607_v45 = vand.u32 4294901760, %v606_v30  ;;  %v438_v46 = vand.u32 4294901760, %v1481_v40  ;;  %v374_v48 = vpop.f32.mrb[7].mxu1  ;;  %1721 = vmatpush3.bf16.msra.mxu0 %v1718_v24  ;;  %v595_v49 = vand.u32 4294901760, %v594_v29  ;;  %v2172_v52 = vpack.c.bf16 %v593_v17, %v586_v22 }
 0x229   :  { %v600_v53 = vand.u32 4294901760, %v599_v36  ;;  %v435_v55 = vand.u32 4294901760, %v374_v48  ;;  %1691 = vmatprep.subr.bf16.mxu1 %v2170_v35  ;;  %v1722_v57 = vpack.c.bf16 %v606_v30, %v599_v36  ;;  %v588_v58 = vand.u32 4294901760, %v587_v34 }
 0x22a   :  { %v608_v61 = vsub.f32 %v606_v30, %v607_v45  ;;  %v620_v62 = vsub.f32 %v1481_v40, %v438_v46  ;;  %1693 = vmatpush3.bf16.msra.mxu1 %v2170_v35  ;;  %v2187_v10 = vsub.f32 %v414_v11, %v2168_v32  ;;  %v513_v20 = vand.u32 4294901760, %v2143_v2 }
 0x22b   :  { %v601_v1 = vsub.f32 %v599_v36, %v600_v53  ;;  %v2180_v4 = vpack.c.bf16 %v438_v46, %v435_v55  ;;  %v613_v5 = vsub.f32 %v374_v48, %v435_v55  ;;  %1723 = vmatprep.subr.bf16.mxu0 %v1722_v57  ;;  %v1702_v6 = vpack.c.bf16 %v595_v49, %v588_v58 }
 0x22c   :  { %v621_v8 = vand.u32 4294901760, %v620_v62  ;;  %1725 = vmatpush3.bf16.msra.mxu0 %v1722_v57  ;;  %v609_v9 = vand.u32 4294901760, %v608_v61  ;;  %v2183_v14 = vpack.c.bf16 %v607_v45, %v600_v53  ;;  %v532_v22 = vsub.f32 %v2146_v3, %v531_v63 }
 0x22d   :  { %v614_v15 = vand.u32 4294901760, %v613_v5  ;;  %1695 = vmatprep.subr.bf16.mxu1 %v2180_v4  ;;  %v1726_v17 = vpack.c.bf16 %v620_v62, %v613_v5  ;;  %v602_v18 = vand.u32 4294901760, %v601_v1  ;;  %v551_v23 = vand.u32 4294901760, %v2178_v0 }
 0x22e   :  { %v622_v19 = vsub.f32 %v620_v62, %v621_v8  ;;  %1697 = vmatpush3.bf16.msra.mxu1 %v2180_v4  ;;  %v523_v2 = vand.u32 4294901760, %v2152_v7  ;;  %v542_v30 = vsub.f32 %v2162_v21, %v541_v12  ;;  %v561_v36 = vand.u32 4294901760, %v2187_v10 }
 0x22f   :  { %v615_v24 = vsub.f32 %v613_v5, %v614_v15  ;;  %1699 = vmatprep.subr.bf16.mxu1 %v1698_v44  ;;  %1727 = vmatprep.subr.bf16.mxu0 %v1726_v17  ;;  %v1706_v28 = vpack.c.bf16 %v609_v9, %v602_v18  ;;  %v2195_v29 = vpack.c.bf16 %v621_v8, %v614_v15  ;;  %v533_v40 = vand.u32 4294901760, %v532_v22 }
 0x230   :  { %1729 = vmatpush3.bf16.msra.mxu0 %v1726_v17  ;;  %v623_v11 = vand.u32 4294901760, %v622_v19  ;;  %v552_v45 = vsub.f32 %v2178_v0, %v551_v23  ;;  %v562_v7 = vsub.f32 %v2187_v10, %v561_v36 }
 0x231   :  { %1731 = vmatprep.subr.bf16.mxu0 %v2135_v56  ;;  %1499 = vmatmul.mubr.f32.vlgmr.msra.gmra.mrb[8].mxu1 %v503_v59  ;;  %v616_v34 = vand.u32 4294901760, %v615_v24  ;;  %v543_v59 = vand.u32 4294901760, %v542_v30 }
 0x232   :  { %1701 = vmatpush3.bf16.msra.mxu1 %v1698_v44  ;;  %1501 = vmatprep.mubr.f32.mxu1 %v513_v20  ;;  %v553_v44 = vand.u32 4294901760, %v552_v45  ;;  %v563_v46 = vand.u32 4294901760, %v562_v7 }
 0x233   :  { %1703 = vmatprep.subr.bf16.mxu1 %v1702_v6  ;;  %1555 = vmatmul.mubr.f32.vlgmr.msra.gmra.mrb[8].mxu0 %v2111_v37  ;;  %v1710_v47 = vpack.c.bf16 %v623_v11, %v616_v34 }
 0x234   :  { %1733 = vmatpush3.bf16.msra.mxu0 %v2135_v56  ;;  %1557 = vmatprep.mubr.f32.mxu0 %v2119_v42 }
 0x235   :  { %1735 = vmatprep.subr.bf16.mxu0 %v2157_v13  ;;  %1502 = vmatmul.mubr.f32.gmra.mrb[10].mxu1 %v523_v2 }
 0x236   :  { %1705 = vmatpush3.bf16.msra.mxu1 %v1702_v6  ;;  %1504 = vmatprep.mubr.f32.mxu1 %v533_v40 }
 0x237   :  { %1707 = vmatprep.subr.bf16.mxu1 %v1706_v28  ;;  %1558 = vmatmul.mubr.f32.gmra.mrb[10].mxu0 %v2122_v43 }
 0x238   :  { %1737 = vmatpush3.bf16.msra.mxu0 %v2157_v13  ;;  %1560 = vmatprep.mubr.f32.mxu0 %v2146_v3 }
 0x239   :  { %1739 = vmatprep.subr.bf16.mxu0 %v2170_v35  ;;  %1505 = vmatmul.mubr.f32.gmra.mrb[12].mxu1 %v543_v59 }
 0x23a   :  { %1709 = vmatpush3.bf16.msra.mxu1 %v1706_v28  ;;  %1507 = vmatprep.mubr.f32.mxu1 %v553_v44 }
 0x23b   :  { %1711 = vmatprep.subr.bf16.mxu1 %v1710_v47  ;;  %1561 = vmatmul.mubr.f32.gmra.mrb[12].mxu0 %v2162_v21 }
 0x23c   :  { %1741 = vmatpush3.bf16.msra.mxu0 %v2170_v35  ;;  %1563 = vmatprep.mubr.f32.mxu0 %v2178_v0 }
 0x23d   :  { %1743 = vmatprep.subr.bf16.mxu0 %v2180_v4  ;;  %1508 = vmatmul.mubr.f32.gmra.mrb[14].mxu1 %v563_v46 }
 0x23e   :  { %1713 = vmatpush3.bf16.msra.mxu1 %v1710_v47  ;;  %1526 = vmatprep.mubr.f32.mxu1 %v2095_v25 }
 0x23f   :  { %1564 = vmatmul.mubr.f32.gmra.mrb[14].mxu0 %v2187_v10  ;;  %1778 = vmatprep.subr.bf16.mxu1 %v2135_v56 }
 0x240   :  { %1745 = vmatpush3.bf16.msra.mxu0 %v2180_v4  ;;  %1582 = vmatprep.mubr.f32.mxu0 %v491_v27 }
 0x241   :  { %1747 = vmatprep.subr.bf16.mxu0 %v2159_v16  ;;  %1527 = vmatmul.mubr.f32.vlgmr.msra.gmra.mrb[8].mxu1 %v2106_v33 }
 0x242   :  { %1782 = vmatpush3.bf16.msra.mxu1 %v2135_v56  ;;  %1529 = vmatprep.mubr.f32.mxu1 %v2113_v38 }
 0x243   :  { %1583 = vmatmul.mubr.f32.vlgmr.msra.gmra.mrb[8].mxu0 %v501_v41  ;;  %1779 = vmatprep.subr.bf16.mxu1 %v2157_v13 }
 0x244   :  { %1749 = vmatpush3.bf16.msra.mxu0 %v2159_v16  ;;  %1585 = vmatprep.mubr.f32.mxu0 %v511_v50 }
 0x245   :  { %1751 = vmatprep.subr.bf16.mxu0 %v2172_v52  ;;  %1530 = vmatmul.mubr.f32.gmra.mrb[10].mxu1 %v2115_v39 }
 0x246   :  { %1783 = vmatpush3.bf16.msra.mxu1 %v2157_v13  ;;  %1532 = vmatprep.mubr.f32.mxu1 %v2131_v51 }
 0x247   :  { %1586 = vmatmul.mubr.f32.gmra.mrb[10].mxu0 %v521_v54  ;;  %1780 = vmatprep.subr.bf16.mxu1 %v2170_v35 }
 0x248   :  { %1753 = vmatpush3.bf16.msra.mxu0 %v2172_v52  ;;  %1588 = vmatprep.mubr.f32.mxu0 %v531_v63 }
 0x249   :  { %1755 = vmatprep.subr.bf16.mxu0 %v2183_v14  ;;  %1533 = vmatmul.mubr.f32.gmra.mrb[12].mxu1 %v2138_v60 }
 0x24a   :  { %1784 = vmatpush3.bf16.msra.mxu1 %v2170_v35  ;;  %1535 = vmatprep.mubr.f32.mxu1 %v2166_v31 }
 0x24b   :  { %1589 = vmatmul.mubr.f32.gmra.mrb[12].mxu0 %v541_v12  ;;  %1781 = vmatprep.subr.bf16.mxu1 %v2180_v4 }
 0x24c   :  { %1757 = vmatpush3.bf16.msra.mxu0 %v2183_v14  ;;  %1591 = vmatprep.mubr.f32.mxu0 %v551_v23 }
 0x24d   :  { %1759 = vmatprep.subr.bf16.mxu0 %v2195_v29  ;;  %1536 = vmatmul.mubr.f32.gmra.mrb[14].mxu1 %v2168_v32 }
 0x24e   :  { %1785 = vmatpush3.bf16.msra.mxu1 %v2180_v4  ;;  %1647 = vmatprep.mubr.f32.mxu1 %v2166_v31 }
 0x24f   :  { %1592 = vmatmul.mubr.f32.gmra.mrb[14].mxu0 %v561_v36 }
 0x250   :  { %1761 = vmatpush3.bf16.msra.mxu0 %v2195_v29  ;;  %1610 = vmatprep.mubr.f32.mxu0 %v2095_v25 }
 0x251   :  { %1763 = vmatprep.subr.bf16.mxu0 %v2135_v56  ;;  %1648 = vmatmul.mubr.f32.vlgmr.msra.gmra.mrb[16].mxu1 %v2168_v32 }
 0x253   :  { %1611 = vmatmul.mubr.f32.vlgmr.msra.gmra.mrb[8].mxu0 %v2106_v33 }
 0x254   :  { %1765 = vmatpush3.bf16.msra.mxu0 %v2135_v56  ;;  %1613 = vmatprep.mubr.f32.mxu0 %v2113_v38 }
 0x255   :  { %1767 = vmatprep.subr.bf16.mxu0 %v2157_v13 }
 0x257   :  { %1614 = vmatmul.mubr.f32.gmra.mrb[10].mxu0 %v2115_v39 }
 0x258   :  { %1769 = vmatpush3.bf16.msra.mxu0 %v2157_v13  ;;  %1616 = vmatprep.mubr.f32.mxu0 %v2131_v51 }
 0x259   :  { %1771 = vmatprep.subr.bf16.mxu0 %v2170_v35 }
 0x25b   :  { %1617 = vmatmul.mubr.f32.gmra.mrb[12].mxu0 %v2138_v60 }
 0x25c   :  { %1773 = vmatpush3.bf16.msra.mxu0 %v2170_v35  ;;  %1619 = vmatprep.mubr.f32.mxu0 %v2166_v31 }
 0x25d   :  { %1775 = vmatprep.subr.bf16.mxu0 %v2180_v4 }
 0x25f   :  { %1620 = vmatmul.mubr.f32.gmra.mrb[14].mxu0 %v2168_v32 }
 0x260   :  { %1777 = vmatpush3.bf16.msra.mxu0 %v2180_v4  ;;  %1638 = vmatprep.mubr.f32.mxu0 %v2095_v25 }
 0x263   :  { %1639 = vmatmul.mubr.f32.vlgmr.msra.gmra.mrb[8].mxu0 %v2106_v33 }
 0x264   :  { %1641 = vmatprep.mubr.f32.mxu0 %v2113_v38 }
 0x267   :  { %1642 = vmatmul.mubr.f32.gmra.mrb[10].mxu0 %v2115_v39 }
 0x268   :  { %1644 = vmatprep.mubr.f32.mxu0 %v2131_v51 }
 0x26b   :  { %1645 = vmatmul.mubr.f32.gmra.mrb[12].mxu0 %v2138_v60 }
 0x314   :  { %v1528_v26 = vpop.f32.mrb[8].mxu1 }
 0x315   :  { %v676_v27 = vpop.f32.mrb[9].mxu1 }
 0x318   :  { %v1531_v37 = vpop.f32.mrb[10].mxu1 }
 0x319   :  { %v688_v41 = vpop.f32.mrb[11].mxu1 }
 0x31c   :  { %v1534_v42 = vpop.f32.mrb[12].mxu1 }
 0x31d   :  { %v700_v43 = vpop.f32.mrb[13].mxu1 }
 0x320   :  { %v1537_v50 = vpop.f32.mrb[14].mxu1 }
 0x321   :  { %v712_v54 = vpop.f32.mrb[15].mxu1 }
 0x324   :  { %v1649_v56 = vpop.f32.mrb[16].mxu1 }
 0x325   :  { %v1244_v25 = vpop.f32.mrb[17].mxu1 }
 0x332   :  { %v1621_v3 = vpop.f32.mrb[14].mxu0 }
 0x333   :  { %v1792_v33 = vadd.f32 %v1621_v3, %v1537_v50  ;;  %v1123_v13 = vpop.f32.mrb[15].mxu0 }
 0x334   :  { %v1794_v38 = vadd.f32 %v1123_v13, %v712_v54 }
 0x335   :  { %v1793_v16 = vadd.f32 %v1792_v33, %v1649_v56 }
 0x336   :  { %v1795_v39 = vadd.f32 %v1794_v38, %v1244_v25  ;;  %v1640_v21 = vpop.f32.mrb[8].mxu0 }
 0x337   :  { %1261 = vst [vmem:[#allocation10 + $0x38] sm:$0xff] %v1793_v16  ;;  %v1786_v51 = vadd.f32 %v1640_v21, %v1528_v26  ;;  %v1208_v60 = vpop.f32.mrb[9].mxu0 }
 0x338   :  { %1260 = vst [vmem:[#allocation10 + $0x30] sm:$0xff] %v1795_v39  ;;  %v1787_v31 = vadd.f32 %v1208_v60, %v676_v27 }
 0x339   :  { %1255 = vst [vmem:[#allocation10 + $0x8] sm:$0xff] %v1786_v51 }
 0x33a   :  { %1254 = vst [vmem:[#allocation10] sm:$0xff] %v1787_v31  ;;  %v1643_v32 = vpop.f32.mrb[10].mxu0 }
 0x33b   :  { %v1788_v35 = vadd.f32 %v1643_v32, %v1531_v37  ;;  %v1220_v48 = vpop.f32.mrb[11].mxu0 }
 0x33c   :  { %v1789_v49 = vadd.f32 %v1220_v48, %v688_v41 }
 0x33d   :  { %1257 = vst [vmem:[#allocation10 + $0x18] sm:$0xff] %v1788_v35 }
 0x33e   :  { %1256 = vst [vmem:[#allocation10 + $0x10] sm:$0xff] %v1789_v49  ;;  %v1646_v52 = vpop.f32.mrb[12].mxu0 }
 0x33f   :  { %v1790_v53 = vadd.f32 %v1646_v52, %v1534_v42  ;;  %v1232_v55 = vpop.f32.mrb[13].mxu0 }
 0x340   :  { %v1791_v57 = vadd.f32 %v1232_v55, %v700_v43 }
 0x341   :  { %1259 = vst [vmem:[#allocation10 + $0x28] sm:$0xff] %v1790_v53 }
 0x342   :  { %1258 = vst [vmem:[#allocation10 + $0x20] sm:$0xff] %v1791_v57 }
 0x343   :  { %1972 = shalt.err (!%p1969_p8)
}
 0x344   :  { %s1973_s22 = scalar_lea.hbm %s2309_s5, 1024 }
 0x345   :  { %p1974_p9 = scmp.ne.s32.totalorder %s2309_s5, %s1973_s22  ;;  %p1977_p10 = scmp.lt.u32.totalorder %s1973_s22, %s2309_s5 }
 0x347   :  { %p1979_p11 = pnand %p1977_p10, %p1974_p9 }
 0x349   :  { %1982 = shalt.err (!%p1979_p11)
}
 0x34a   :  { %1273 = dma.vmem_to_hbm [thread:$0]  %s1268_s17, 1024, %s2309_s5, [#allocation4], %s1996_s0, %s1996_s0, %s1997_s21  }
 0x34b   :  { %1989 = dma.done.wait [#allocation4], 1024  }
 0x34c   :  { %1990 = vsyncadd [#allocation4], 4294966272 }
 0x34d   :  { %1277 = vsyncpa [#allocation3], 1 }
 0x34e   :  { %1278 = vsyncpa [#allocation6], 1 }
 0x34f   :  { %1279 = vsyncpa [#allocation9], 1 }
 0x350   :  { %1280 = vsyncpa [#allocation4], 1 }

</bundles_post_ra>
